<compile_context>
chip_gen: v5e
topology: v5e:2x2
jax: 0.10.0
libtpu: 0.0.40
codegen_flags: <defaults>
</compile_context>

<pallas_src>
import jax
import jax.numpy as jnp
from jax.experimental import pallas as pl
from jax.experimental.pallas import tpu as pltpu


def _ac_loss_kernel(x_ref, t_ref, out_ref):
    """One (batch, channel-tile) grid step.

    x_ref:   (1, tc, H, W) network-output block, native dtype.
    t_ref:   (1, H, W) narrow-int dense class-index map, already spatially
             transposed in the wrapper (replicates one_hot(...).transpose(1,-1)).
    out_ref: (1, 1, 2, tc) f32 — row 0: per-channel length partial sums,
                                 row 1: per-channel region partial sums.
    """
    _, tc, H, W = x_ref.shape
    x = x_ref[0]                                            # (tc, H, W), native dtype

    # ---- Length (contour) term: fused cropped differences, no abs ----------
    #   dy[i, j] = x[i+2, j]   - x[i+1, j]    for i < H-2, j < W-2
    #   dx[i, j] = x[i,   j+2] - x[i,   j+1]  for i < H-2, j < W-2
    dyc = (x[:, 2:, :-2] - x[:, 1:-1, :-2]).astype(jnp.float32)   # (tc, H-2, W-2)
    dxc = (x[:, :-2, 2:] - x[:, :-2, 1:-1]).astype(jnp.float32)   # (tc, H-2, W-2)
    contour = jnp.sqrt(dyc * dyc + dxc * dxc + 1e-6)
    # Sublane (H) reduction first, then a single cross-lane reduce per channel.
    len_c = jnp.sum(jnp.sum(contour, axis=1), axis=-1)            # (tc,)

    # ---- Region term: binary one-hot algebra => where(t == c, 1 - x, x) ----
    t = t_ref[0].astype(jnp.int32)                                 # (H, W)
    c0 = pl.program_id(1) * tc                                     # first class id of this tile
    cls = c0 + jax.lax.broadcasted_iota(jnp.int32, (tc, H, W), 0)  # (tc, H, W)
    xf = x.astype(jnp.float32)
    region = jnp.where(cls == t[None, :, :], 1.0 - xf, xf)        # (tc, H, W)
    reg_c = jnp.sum(jnp.sum(region, axis=1), axis=-1)             # (tc,)

    # Pack both per-channel partial sums into the single small output block.
    out_ref[...] = jnp.concatenate(
        [len_c[None, :], reg_c[None, :]], axis=0)[None, None]      # (1, 1, 2, tc)


def _vmem_budget_bytes():
    """Per-generation VMEM limit: ~48 MiB on v7x (64 MiB phys), ~96 MiB on v5e/v6e."""
    phys = 64 * 1024 * 1024                      # conservative default (v7x physical)
    try:
        info = pltpu.get_tpu_info()
        phys = int(getattr(info, "vmem_capacity_bytes", phys)) or phys
    except Exception:
        pass
    return max(32 * 1024 * 1024, min(phys * 3 // 4, 100 * 1024 * 1024))


def _choose_channel_tile(N, C, H, W, x_itemsize, t_itemsize, vmem_limit):
    """Largest channel tile (a divisor of C) whose per-step footprint fits VMEM."""
    usable = int(vmem_limit * 0.8)                       # headroom for compiler scratch
    # double-buffered input slab + ~f32 temporaries (contour/region/iota) per channel
    per_channel = H * W * (2 * x_itemsize + 20)
    fixed = 2 * H * W * t_itemsize + (256 << 10)         # double-buffered target + slack
    tc_max = max(1, (usable - fixed) // per_channel)
    tc_max = int(min(tc_max, C))
    if N == 1 and C >= 2:
        # Guarantee >= 2 steps on a parallel axis so both v7x TensorCores get work.
        tc_max = min(tc_max, C // 2)
    tc = 1
    for d in range(1, max(1, tc_max) + 1):
        if C % d == 0:
            tc = d
    return tc


def ac_loss_pallas(output, target, num_classes, region_weight=0.5):
    """ACLoss(num_classes, region_weight).forward(output, target) for 2-D data.

    output: (N, C, H, W) float (H == W)
    target: (N, H, W) integer class indices in [0, num_classes)
    """
    assert 0.0 <= region_weight <= 1.0, "region_weight must be between 0 and 1"
    # TODO(synk): 5-D volumetric (N, C, D, H, W) branch of get_length not implemented.
    assert output.ndim == 4, "only 2D data (N, C, H, W) supported"
    N, C, H, W = output.shape
    assert H == W, "All spatial dims must have the same size"
    assert H >= 3 and W >= 3, "spatial dims must be >= 3 for the length term"
    assert C == num_classes
    # TODO(synk): pre-one-hot float targets (target.ndim == output.ndim) not implemented.
    assert target.ndim == output.ndim - 1, "expected dense class-index target"

    # F.one_hot(target).transpose(1, -1) spatially transposes the one-hot map; we
    # replicate it by transposing the dense index map.  The transpose is fused with
    # the narrowing int8 cast into a single cheap XLA pass (1 B/px written), so there
    # is no separate HBM transpose kernel and the Pallas kernel reads 4x fewer
    # target bytes per channel tile.
    t_dtype = jnp.int8 if num_classes <= 127 else jnp.int32
    t = jnp.swapaxes(target, 1, 2).astype(t_dtype)       # (N, W, H); H == W

    x_itemsize = jnp.dtype(output.dtype).itemsize
    t_itemsize = jnp.dtype(t_dtype).itemsize
    vmem_limit = _vmem_budget_bytes()
    tc = _choose_channel_tile(N, C, H, W, x_itemsize, t_itemsize, vmem_limit)
    n_ct = C // tc

    cost = pl.CostEstimate(
        flops=int(N * C * (6 * (H - 2) * (W - 2) + 4 * H * W)),
        transcendentals=int(N * C * (H - 2) * (W - 2)),     # sqrt per cropped element
        bytes_accessed=int(output.size * x_itemsize
                           + n_ct * t.size * t_itemsize
                           + N * n_ct * 2 * tc * 4),
    )

    # NOTE: per-(n, c-tile) sums are single-pass f32 accumulations; for extreme
    # image sizes (>= 2k x 2k) consider chunked / Kahan accumulation.
    sums = pl.pallas_call(
        _ac_loss_kernel,
        out_shape=jax.ShapeDtypeStruct((N, n_ct, 2, tc), jnp.float32),
        grid_spec=pltpu.PrefetchScalarGridSpec(
            num_scalar_prefetch=0,
            grid=(N, n_ct),
            in_specs=[
                pl.BlockSpec((1, tc, H, W), lambda n, c: (n, c, 0, 0)),
                pl.BlockSpec((1, H, W), lambda n, c: (n, 0, 0)),
            ],
            out_specs=pl.BlockSpec((1, 1, 2, tc), lambda n, c: (n, c, 0, 0)),
        ),
        compiler_params=pltpu.CompilerParams(
            # Each (n, c-tile) step writes its own output block => no cross-step
            # accumulator, so both axes can be split across TensorCores.
            dimension_semantics=("parallel", "parallel"),
            vmem_limit_bytes=int(vmem_limit),
        ),
        cost_estimate=cost,
    )(output, t)

    length_sum = jnp.sum(sums[:, :, 0, :])
    region_sum = jnp.sum(sums[:, :, 1, :])

    length_term = length_sum / float(N * C * (H - 2) * (W - 2))
    region_term = region_sum / float(N * C * H * W)

    # Static-float branching, mirroring the reference's `if self.region_weight ...`.
    rw = float(region_weight)
    loss = jnp.float32(0.0)
    if rw < 1.0:
        loss = loss + (1.0 - rw) * length_term
    if rw > 0.0:
        loss = loss + rw * region_term
    return loss


def _ac_loss_ref(output, target, num_classes, region_weight=0.5):
    """Pure-JAX reference mirroring the PyTorch module exactly (2-D data path)."""
    output = output.astype(jnp.float32)
    if target.ndim == output.ndim - 1:
        onehot = jax.nn.one_hot(target, num_classes, dtype=jnp.float32)  # (N, H, W, C)
        tgt = jnp.swapaxes(onehot, 1, -1)                                # (N, C, W, H)
    else:
        tgt = target.astype(jnp.float32)
    # get_length
    dy = output[:, :, 1:, :] - output[:, :, :-1, :]
    dx = output[:, :, :, 1:] - output[:, :, :, :-1]
    dy = dy[:, :, 1:, :-2] ** 2
    dx = dx[:, :, :-2, 1:] ** 2
    delta_pred = jnp.abs(dy + dx)
    length = jnp.mean(jnp.sqrt(delta_pred + 1e-6))
    # get_region
    region_in = jnp.mean(output * (tgt - 1.0) ** 2)
    region_out = jnp.mean((1.0 - output) * tgt ** 2)
    region = region_in + region_out
    length_term = length if region_weight < 1.0 else 0.0
    region_term = region if region_weight > 0.0 else 0.0
    return (1.0 - region_weight) * length_term + region_weight * region_term


if __name__ == "__main__":
    key = jax.random.PRNGKey(0)
    k1, k2 = jax.random.split(key)

    # Small shapes consistent with the module (square spatial, dense class target).
    N, C, H, W = 2, 4, 16, 16
    logits = jax.random.normal(k1, (N, C, H, W), dtype=jnp.float32)
    output = jax.nn.softmax(logits, axis=1)                       # network "probabilities"
    target = jax.random.randint(k2, (N, H, W), 0, C, dtype=jnp.int32)

    loss = ac_loss_pallas(output, target, num_classes=C, region_weight=0.5)
    loss = jax.block_until_ready(loss)

    ref = _ac_loss_ref(output, target, num_classes=C, region_weight=0.5)
    assert jnp.allclose(loss, ref, atol=1e-5, rtol=1e-5), (loss, ref)

    print("KERNEL_OK")
</pallas_src>

<mosaic_0001>
module attributes {stable_mosaic.version = 11 : i64} {
  func.func @_ac_loss_kernel(%arg0: i32, %arg1: i32, %arg2: memref<1x4x16x16xf32, #tpu.memory_space<vmem>>, %arg3: memref<1x16x16xi8, #tpu.memory_space<vmem>>, %arg4: memref<1x1x2x4xf32, #tpu.memory_space<vmem>>) attributes {dimension_semantics = [#tpu.dimension_semantics<parallel>, #tpu.dimension_semantics<parallel>], iteration_bounds = array<i64: 2, 1>, scalar_prefetch = 0 : i64, scratch_operands = 0 : i64, tpu.core_type = #tpu.core_type<tc>, window_params = [{transform_indices = @transform_0, window_bounds = array<i64: 1, 4, 16, 16>}, {transform_indices = @transform_1, window_bounds = array<i64: 1, 16, 16>}, {transform_indices = @transform_2, window_bounds = array<i64: 1, 1, 2, 4>}]} {
    %c0 = arith.constant 0 : index
    %c0_0 = arith.constant 0 : index
    %c0_1 = arith.constant 0 : index
    %c0_2 = arith.constant 0 : index
    %0 = vector.load %arg2[%c0, %c0_0, %c0_1, %c0_2] : memref<1x4x16x16xf32, #tpu.memory_space<vmem>>, vector<1x4x16x16xf32>
    %1 = vector.shape_cast %0 : vector<1x4x16x16xf32> to vector<4x16x16xf32>
    %2 = vector.extract_strided_slice %1 {offsets = [0, 2, 0], sizes = [4, 14, 14], strides = [1, 1, 1]} : vector<4x16x16xf32> to vector<4x14x14xf32>
    %3 = vector.extract_strided_slice %1 {offsets = [0, 1, 0], sizes = [4, 14, 14], strides = [1, 1, 1]} : vector<4x16x16xf32> to vector<4x14x14xf32>
    %4 = arith.subf %2, %3 : vector<4x14x14xf32>
    %5 = vector.extract_strided_slice %1 {offsets = [0, 0, 2], sizes = [4, 14, 14], strides = [1, 1, 1]} : vector<4x16x16xf32> to vector<4x14x14xf32>
    %6 = vector.extract_strided_slice %1 {offsets = [0, 0, 1], sizes = [4, 14, 14], strides = [1, 1, 1]} : vector<4x16x16xf32> to vector<4x14x14xf32>
    %7 = arith.subf %5, %6 : vector<4x14x14xf32>
    %8 = arith.mulf %4, %4 : vector<4x14x14xf32>
    %9 = arith.mulf %7, %7 : vector<4x14x14xf32>
    %10 = arith.addf %8, %9 : vector<4x14x14xf32>
    %cst = arith.constant 9.99999997E-7 : f32
    %11 = vector.broadcast %cst : f32 to vector<4x14x14xf32>
    %12 = arith.addf %10, %11 : vector<4x14x14xf32>
    %13 = math.sqrt %12 : vector<4x14x14xf32>
    %cst_3 = arith.constant dense<0.000000e+00> : vector<4x14xf32>
    %14 = vector.multi_reduction <add>, %13, %cst_3 [1] : vector<4x14x14xf32> to vector<4x14xf32>
    %cst_4 = arith.constant dense<0.000000e+00> : vector<4xf32>
    %15 = vector.multi_reduction <add>, %14, %cst_4 [1] : vector<4x14xf32> to vector<4xf32>
    %c0_5 = arith.constant 0 : index
    %c0_6 = arith.constant 0 : index
    %c0_7 = arith.constant 0 : index
    %16 = vector.load %arg3[%c0_5, %c0_6, %c0_7] : memref<1x16x16xi8, #tpu.memory_space<vmem>>, vector<1x16x16xi8>
    %17 = vector.shape_cast %16 : vector<1x16x16xi8> to vector<16x16xi8>
    %18 = arith.extsi %17 : vector<16x16xi8> to vector<16x16xi32>
    %c4_i32 = arith.constant 4 : i32
    %19 = arith.muli %arg1, %c4_i32 : i32
    %20 = tpu.iota {dimensions = array<i32: 0>} : vector<4x16x16xi32>
    %21 = vector.broadcast %19 : i32 to vector<4x16x16xi32>
    %22 = arith.addi %21, %20 : vector<4x16x16xi32>
    %23 = vector.shape_cast %18 : vector<16x16xi32> to vector<1x16x16xi32>
    %24 = vector.broadcast %23 : vector<1x16x16xi32> to vector<4x16x16xi32>
    %25 = arith.cmpi eq, %22, %24 : vector<4x16x16xi32>
    %cst_8 = arith.constant 1.000000e+00 : f32
    %26 = vector.broadcast %cst_8 : f32 to vector<4x16x16xf32>
    %27 = arith.subf %26, %1 : vector<4x16x16xf32>
    %28 = arith.select %25, %27, %1 : vector<4x16x16xi1>, vector<4x16x16xf32>
    %cst_9 = arith.constant dense<0.000000e+00> : vector<4x16xf32>
    %29 = vector.multi_reduction <add>, %28, %cst_9 [1] : vector<4x16x16xf32> to vector<4x16xf32>
    %cst_10 = arith.constant dense<0.000000e+00> : vector<4xf32>
    %30 = vector.multi_reduction <add>, %29, %cst_10 [1] : vector<4x16xf32> to vector<4xf32>
    %31 = vector.shape_cast %15 : vector<4xf32> to vector<1x4xf32>
    %32 = vector.shape_cast %30 : vector<4xf32> to vector<1x4xf32>
    %33 = tpu.concatenate %31, %32 in 0 : vector<1x4xf32>, vector<1x4xf32> -> vector<2x4xf32>
    %34 = vector.shape_cast %33 : vector<2x4xf32> to vector<1x1x2x4xf32>
    %c0_11 = arith.constant 0 : index
    %c0_12 = arith.constant 0 : index
    %c0_13 = arith.constant 0 : index
    %c0_14 = arith.constant 0 : index
    %35 = vector.load %arg4[%c0_11, %c0_12, %c0_13, %c0_14] : memref<1x1x2x4xf32, #tpu.memory_space<vmem>>, vector<1x1x2x4xf32>
    tpu.vector_store %arg4[%c0_11, %c0_12, %c0_13, %c0_14], %34 {strides = array<i32>} : memref<1x1x2x4xf32, #tpu.memory_space<vmem>>, vector<1x1x2x4xf32>,
    return
  }
  func.func @transform_0(%arg0: i32, %arg1: i32) -> (i32, i32, i32, i32) {
    %c0_i32 = arith.constant 0 : i32
    %c0_i32_0 = arith.constant 0 : i32
    %c0_i32_1 = arith.constant 0 : i32
    return %arg0, %arg1, %c0_i32, %c0_i32_0 : i32, i32, i32, i32
  }
  func.func @transform_1(%arg0: i32, %arg1: i32) -> (i32, i32, i32) {
    %c0_i32 = arith.constant 0 : i32
    %c0_i32_0 = arith.constant 0 : i32
    %c0_i32_1 = arith.constant 0 : i32
    return %arg0, %c0_i32, %c0_i32_0 : i32, i32, i32
  }
  func.func @transform_2(%arg0: i32, %arg1: i32) -> (i32, i32, i32, i32) {
    %c0_i32 = arith.constant 0 : i32
    %c0_i32_0 = arith.constant 0 : i32
    %c0_i32_1 = arith.constant 0 : i32
    return %arg0, %arg1, %c0_i32, %c0_i32_0 : i32, i32, i32, i32
  }
}

</mosaic_0001>

<bundles_post_ra>
// kernel: tpu_custom_call.1
= control target key start
LH: loop header
LB: loop body
LE: loop exit
PB: predicated region body
PF: predicated region fallthrough
CT: control target
= control target key end

     0   :  { %s1447_s0 = inlined_call_operand.hbm [shape: f32[2,4,16,16], index: 0, kind: input, shape index: {}]   ;;  %s1448_s1 = inlined_call_operand.hbm [shape: s8[2,16,16], index: 1, kind: input, shape index: {}]   ;;  %s1449_s2 = inlined_call_operand.hbm [shape: f32[2,1,2,4], index: 2, kind: output, shape index: {}]  }
   0x1   :  { %1450 = sst [smem:[#allocation11_spill]] %s1447_s0 }
   0x2   :  { %7 = vsyncpa [#allocation3], 0 }
   0x3   :  { %9 = vsyncpa [#allocation3 + $0x1], 0 }
   0x4   :  { %10 = vsyncpa [#allocation6], 0 }
   0x5   :  { %12 = vsyncpa [#allocation6 + $0x1], 0 }
   0x6   :  { %13 = vsyncpa [#allocation4], 0 }
   0x7   :  { %15 = vsyncpa [#allocation4 + $0x1], 0  ;;  %s1063_s9 = smov 0   ;;  %s1065_s10 = smov 0  }
   0x8   :  { %s1067_s11 = smov 0   ;;  %s1069_s12 = smov 0  }
   0x9   :  { %s1071_s13 = smov 0   ;;  %s1073_s14 = smov 0  }
   0xa LB: > { %s773_s15 = sadd.s32 4294967295, %s1040_s14   ;;  %s774_s16 = sadd.s32 4294967294, %s1040_s14   ;;  %s1040_s14 = sphi %s1073_s14, %s21_s14   ;;  %s1036_s13 = sphi %s1071_s13, %s1461_s13   ;;  %s1032_s12 = sphi %s1069_s12, %s1460_s12   ;;  %s1028_s11 = sphi %s1067_s11, %s1459_s11   ;;  %s1024_s10 = sphi %s1065_s10, %s1458_s10   ;;  %s1020_s9 = sphi %s1063_s9, %s1457_s9  }
   0xb   : > { %s33_s17 = sadd.s32 1, %s1036_s13  ;;  %s42_s18 = sadd.s32 1, %s1028_s11 }
   0xc   : > { %p35_p0 = scmp.ge.s32.totalorder %s33_s17, 2  ;;  %p49_p1 = scmp.ne.s32.totalorder %s1028_s11, %s1024_s10 }
   0xd   : > { %p50_p2 = scmp.eq.s32.totalorder %s1040_s14, 0  ;;  %p55_p3 = scmp.ne.s32.totalorder %s1024_s10, %s1020_s9 }
   0xe   : > { %s1463_s17 = smov (%p35_p0, %s33_s17), 0  ;;  %p56_p5 = scmp.eq.s32.totalorder %s773_s15, 0 }
   0xf   : > { %p1104_p4 = por %p50_p2, %p49_p1  ;;  %s37_s20 = ssub.s32 %s1036_s13, %s1463_s17 }
  0x10   : > { %p107_p6 = scmp.eq.s32.totalorder %s773_s15, 1  ;;  %p40_p7 = scmp.eq.s32.totalorder %s37_s20, 0 }
  0x11   : > { %p1110_p8 = por %p56_p5, %p55_p3  ;;  %p113_p10 = scmp.eq.s32.totalorder %s774_s16, 1 }
  0x12   : > { %p1114_p9 = por %p107_p6, %p49_p1  ;;  %p776_p12 = scmp.ge.s32.totalorder %s1040_s14, 2 }
  0x13   : > { %s1119_s23 = scalar_select %p40_p7, %s1028_s11, %s42_s18  }
  0x14   : > { %p1121_p11 = por %p113_p10, %p55_p3  ;;  %p822_p13 = scmp.lt.s32.totalorder %s1040_s14, 2 }
  0x15   : > { %s1128_s25 = sand.u32 1, %s1028_s11   ;;  %s799_s27 = sshll.u32 %s1036_s13, 6 }
  0x16   : > { %s777_s26 = sshll.u32 %s1128_s25, 6  ;;  %s1455_s0 = sld [smem:[#allocation11_spill]] }
  0x17   : > { %s137_s3 = scalar_lea.vmem [#allocation2], %s777_s26  ;;  %p1137_p0 = pnand %p822_p13, %p1104_p4 }
  0x18   : > { %s148_s4 = sshll.u32 %s137_s3, 4  ;;  %p783_p1 = scmp.ge.s32.totalorder %s1040_s14, 1  ;;  %s149_s4 = int_to_ptr.vmem [resolvable:$true] %s148_s4 }
  0x19   : > { %s134_s7 = scalar_lea.sflag [#allocation3], %s1128_s25  ;;  %s1042_s8 = smov 128  }
  0x1a   : > { %s1043_s15 = smov 8   ;;  %p178_p2 = scmp.lt.s32.totalorder %s1040_s14, 3 }
  0x1b   : > { %s780_s16 = sshll.u32 %s1128_s25, 2  ;;  %s800_s18 = sshll.u32 %s1036_s13, 2 }
  0x1c   : > { %s145_s30 = scalar_lea.hbm %s1455_s0, %s799_s27  ;;  %p179_p3 = pnand %p783_p1, %p178_p2 }
  0x1d   : > { %s146_s5 = sshll.u32 %s145_s30, 4  ;;  %s167_s19 = scalar_lea.hbm %s1448_s1, %s800_s18  ;;  %s147_s5 = int_to_ptr.hbm [resolvable:$true] %s146_s5 }
  0x1e   : > { %814 = dma.hbm_to_vmem [thread:$0]  (!%p1137_p0), %s147_s5, 1024, %s149_s4, %s134_s7, %s1042_s8, %s1042_s8, %s1043_s15  }
  0x1f   : > { %s162_s27 = scalar_lea.vmem [#allocation5], %s780_s16  ;;  %s168_s29 = sshll.u32 %s167_s19, 4  ;;  %s169_s29 = int_to_ptr.hbm [resolvable:$true] %s168_s29 }
  0x20   : > { %s170_s28 = sshll.u32 %s162_s27, 4  ;;  %s159_s30 = scalar_lea.sflag [#allocation6], %s1128_s25  ;;  %s171_s28 = int_to_ptr.vmem [resolvable:$true] %s170_s28 }
  0x21   : > { %s1044_s3 = smov 32   ;;  %s1045_s0 = smov 2  }
  0x22   : > { %817 = dma.hbm_to_vmem [thread:$0]  (!%p1137_p0), %s169_s29, 64, %s171_s28, %s159_s30, %s1044_s3, %s1044_s3, %s1045_s0  }
  0x23   : > { %182 = sbr.rel (%p179_p3) target bundleno = 465 (0x1d1), region = 28  ;;  %s1155_s4 = sand.u32 (!%p179_p3), 1, %s1024_s10  }
  0x24   : > { %s784_s5 = sshll.u32 (!%p179_p3), %s1155_s4, 6  ;;  %s185_s7 = scalar_lea.sflag (!%p179_p3), [#allocation3], %s1155_s4 }
  0x25   : > { %s188_s8 = scalar_lea.vmem (!%p179_p3), [#allocation2], %s784_s5 }
  0x28   : > { %1007 = dma.done.wait (%p1110_p8), %s185_s7, 1024  }
  0x29   : > { %1009 = vsyncadd (%p1110_p8), %s185_s7, 4294966272  ;;  %s785_s25 = sshll.u32 %s1155_s4, 2  ;;  %s195_s0 = scalar_lea.sflag [#allocation6], %s1155_s4 }
  0x2a   : > { %s1165_s6 = scalar_lea.vmem [#allocation5], %s785_s25 }
  0x2b   : > { %1011 = dma.done.wait (%p1110_p8), %s195_s0, 64  }
  0x2c   : > { %1013 = vsyncadd (%p1110_p8), %s195_s0, 4294967232  ;;  %v1171_v0 = vld [vmem:[%s188_s8 + $0x10] sm:$0xff]  ;;  %v1173_v1 = vld [vmem:[%s188_s8] sm:$0xff]  ;;  %s1046_s15 = smov 1   ;;  %s1047_s21 = smov 126   ;;  %vm327_vm0 = vcmask 1041408  }
  0x2d   : > { %275 = vrot.lane.b32.xlu1 %v1171_v0, %s1046_s15  ;;  %271 = vrot.lane.b32.xlu0 %v1173_v1, %s1046_s15  ;;  %v1177_v2 = vld [vmem:[%s188_s8 + $0x20] sm:$0xff]  ;;  %v1180_v3 = vld [vmem:[%s188_s8 + $0x18] sm:$0xff]  ;;  %v243_v44 = vrot.slane %v1173_v1, 7  ;;  %v246_v48 = vrot.slane %v1171_v0, 7  ;;  %vm242_vm1 = vcmask 1040384   ;;  %vm591_vm10 = vcmask 130048  }
  0x2e   : > { %279 = vrot.lane.b32.xlu2 %v1177_v2, %s1046_s15  ;;  %v1182_v4 = vld [vmem:[%s188_s8 + $0x8] sm:$0xff]  ;;  %v1189_v6 = vld [vmem:[%s188_s8 + $0x38] sm:$0xff]  ;;  %v1191_v7 = vld [vmem:[%s188_s8 + $0x30] sm:$0xff]  ;;  %v249_v45 = vrot.slane %v1177_v2, 7  ;;  %v247_v49 = vrot.slane %v1180_v3, 7  ;;  %vm547_vm13 = vcmask 1041409  }
  0x2f   : > { %v1184_v5 = vld [vmem:[%s188_s8 + $0x28] sm:$0xff]  ;;  %v263_v46 = vsub.f32 %v1173_v1, %v243_v44  ;;  %v252_v61 = vrot.slane %v1191_v7, 7  ;;  %v802_v62 = vld [vmem:[%s1165_s6] sm:$0xf]   ;;  %vm549_vm15 = vcmask 1042434   ;;  %s786_s16 = sshll.u32 %s1155_s4, 1 }
  0x30   : > { %v267_v47 = vsub.f32 %v1177_v2, %v249_v45  ;;  %v248_v52 = vsel %vm242_vm1, %v246_v48, %v247_v49  ;;  %s796_s18 = sshll.u32 %s1032_s12, 1  ;;  %s224_s27 = scalar_lea.vmem [#allocation7], %s786_s16 }
  0x31   : > { %v303_v50 = vmul.f32 %v263_v46, %v263_v46  ;;  %v266_v57 = vsub.f32 %v1180_v3, %v248_v52  ;;  %v581_v46 = vsub.f32 1.0, %v1191_v7  ;;  %s663_s19 = scalar_lea.hbm %s1449_s2, %s796_s18  ;;  %s665_s28 = sshll.u32 %s224_s27, 4  ;;  %s666_s28 = int_to_ptr.vmem [resolvable:$true] %s665_s28 }
  0x32   : > { %v307_v51 = vmul.f32 %v267_v47, %v267_v47  ;;  %v580_v47 = vsub.f32 1.0, %v1184_v5  ;;  %s667_s29 = sshll.u32 %s663_s19, 4  ;;  %s652_s12 = scalar_lea.sflag [#allocation4], %s1155_s4  ;;  %s668_s29 = int_to_ptr.hbm [resolvable:$true] %s667_s29 }
  0x33   : > { %v306_v60 = vmul.f32 %v266_v57, %v266_v57  ;;  %s968_s30 = sshra.s32 %s668_s29, 4  ;;  %s974_s8 = scalar_lea.hbm %s1449_s2, 4  ;;  %s969_s30 = int_to_ptr.hbm [resolvable:$true] %s968_s30 }
  0x34   : > { %s970_s3 = scalar_lea.hbm %s969_s30, 2  ;;  %p975_p7 = scmp.lt.s32.totalorder %s969_s30, %s1449_s2 }
  0x35   : > { %277 = vrot.lane.b32.xlu1 %v1180_v3, %s1046_s15  ;;  %273 = vrot.lane.b32.xlu0 %v1182_v4, %s1046_s15  ;;  %p971_p4 = scmp.ne.s32.totalorder %s969_s30, %s970_s3  ;;  %p976_p8 = scmp.lt.s32.totalorder %s974_s8, %s970_s3 }
  0x36   : > { %281 = vrot.lane.b32.xlu2 %v1184_v5, %s1046_s15 }
  0x37   : > { %p972_p5 = pnand %p971_p4, %p1114_p9  ;;  %p977_p10 = por %p976_p8, %p975_p7 }
  0x39   : > { %p973_p6 = pneg %p972_p5 }
  0x3b   : > { %p978_p13 = pnand %p977_p10, %p973_p6 }
  0x3d   : > { %285 = vrot.lane.b32.xlu1 %v1189_v6, %s1046_s15  ;;  %283 = vrot.lane.b32.xlu0 %v1191_v7, %s1046_s15 }
  0x88   : > { %v280_v8 = vpop.permute.xlu2 %279 }
  0x89   : > { %v299_v9 = vsub.f32 %v1177_v2, %v280_v8 }
  0x8b   : > { %v315_v10 = vmul.f32 %v299_v9, %v299_v9  ;;  %v269_v9 = vsub.f32 %v1191_v7, %v252_v61 }
  0x8d   : > { %v334_v11 = vrot.slane %v315_v10, 6 }
  0x8f   : > { %348 = vrot.lane.b32.xlu0 %v334_v11, %s1047_s21 }
  0x90   : > { %v282_v12 = vpop.permute.xlu2 %281 }
  0x91   : > { %v300_v17 = vsub.f32 %v1184_v5, %v282_v12 }
  0x93   : > { %v316_v22 = vmul.f32 %v300_v17, %v300_v17  ;;  %v1241_v17 = vunpack.c.1.s8 %v802_v62 }
  0x95   : > { %v335_v27 = vrot.slane %v316_v22, 6  ;;  %v575_v22 = vsub.f32 1.0, %v1173_v1  ;;  %vm790_vm4 = vcmp.eq.s32.totalorder %v1241_v17, 1  ;;  %vm788_vm5 = vcmp.eq.s32.totalorder %v1241_v17, 0 }
  0x96   : > { %vm792_vm7 = vcmp.eq.s32.totalorder %v1241_v17, 2  ;;  %vm794_vm9 = vcmp.eq.s32.totalorder %v1241_v17, 3 }
  0x97   : > { %v336_v32 = vsel %vm327_vm0, %v334_v11, %v335_v27  ;;  %v1232_v11 = vunpack.c.0.s8 %v802_v62  ;;  %v253_v27 = vrot.slane %v1189_v6, 7 }
  0x99   : > { %vm789_vm2 = vcmp.eq.s32.totalorder %v1232_v11, 1  ;;  %vm787_vm3 = vcmp.eq.s32.totalorder %v1232_v11, 0  ;;  %vm791_vm6 = vcmp.eq.s32.totalorder %v1232_v11, 2  ;;  %vm793_vm8 = vcmp.eq.s32.totalorder %v1232_v11, 3 }
  0x9f   : > { %v276_v13 = vpop.permute.xlu1 %275  ;;  %v272_v14 = vpop.permute.xlu0 %271 }
  0xa0   : > { %v297_v15 = vsub.f32 %v1171_v0, %v276_v13  ;;  %v295_v16 = vsub.f32 %v1173_v1, %v272_v14 }
  0xa2   : > { %v313_v18 = vmul.f32 %v297_v15, %v297_v15  ;;  %v311_v19 = vmul.f32 %v295_v16, %v295_v16  ;;  %v250_v15 = vrot.slane %v1184_v5, 7  ;;  %v244_v16 = vrot.slane %v1182_v4, 7 }
  0xa4   : > { %v331_v20 = vrot.slane %v313_v18, 6  ;;  %v328_v21 = vrot.slane %v311_v19, 6 }
  0xa6   : > { %344 = vrot.lane.b32.xlu1 %v331_v20, %s1047_s21  ;;  %340 = vrot.lane.b32.xlu2 %v328_v21, %s1047_s21 }
  0xa7   : > { %v278_v23 = vpop.permute.xlu1 %277  ;;  %v274_v24 = vpop.permute.xlu0 %273 }
  0xa8   : > { %v298_v25 = vsub.f32 %v1180_v3, %v278_v23  ;;  %v296_v26 = vsub.f32 %v1182_v4, %v274_v24  ;;  %v578_v23 = vsub.f32 1.0, %v1180_v3 }
  0xaa   : > { %v314_v28 = vmul.f32 %v298_v25, %v298_v25  ;;  %v312_v29 = vmul.f32 %v296_v26, %v296_v26  ;;  %v251_v25 = vsel %vm242_vm1, %v249_v45, %v250_v15  ;;  %v245_v26 = vsel %vm242_vm1, %v243_v44, %v244_v16 }
  0xac   : > { %v332_v30 = vrot.slane %v314_v28, 6  ;;  %v329_v31 = vrot.slane %v312_v29, 6 }
  0xae   : > { %350 = vrot.lane.b32.xlu1 %v336_v32, %s1047_s21  ;;  %v333_v33 = vsel %vm327_vm0, %v331_v20, %v332_v30  ;;  %v330_v34 = vsel %vm327_vm0, %v328_v21, %v329_v31  ;;  %v309_v20 = vmul.f32 %v269_v9, %v269_v9  ;;  %v577_v21 = vsub.f32 1.0, %v1171_v0 }
  0xaf   : > { %v286_v35 = vpop.permute.xlu1 %285  ;;  %346 = vrot.lane.b32.xlu2 %v333_v33, %s1047_s21  ;;  %342 = vrot.lane.b32.xlu0 %v330_v34, %s1047_s21  ;;  %v284_v36 = vpop.permute.xlu0 %283  ;;  %v265_v30 = vsub.f32 %v1171_v0, %v246_v48  ;;  %v579_v31 = vsub.f32 1.0, %v1177_v2  ;;  %v576_v32 = vsub.f32 1.0, %v1182_v4 }
  0xb0   : > { %v302_v37 = vsub.f32 %v1189_v6, %v286_v35  ;;  %v301_v38 = vsub.f32 %v1191_v7, %v284_v36  ;;  %v585_v34 = vsel %vm789_vm2, %v577_v21, %v1171_v0  ;;  %v268_v35 = vsub.f32 %v1184_v5, %v251_v25 }
  0xb1   : > { %v264_v36 = vsub.f32 %v1182_v4, %v245_v26  ;;  %v305_v44 = vmul.f32 %v265_v30, %v265_v30  ;;  %v584_v45 = vsel %vm788_vm5, %v576_v32, %v1182_v4  ;;  %vm636_vm5 = vcmask 125952  }
  0xb2   : > { %v318_v39 = vmul.f32 %v302_v37, %v302_v37  ;;  %v317_v40 = vmul.f32 %v301_v38, %v301_v38  ;;  %v583_v38 = vsel %vm787_vm3, %v575_v22, %v1173_v1  ;;  %v593_v62 = vsel %vm591_vm10, %v584_v45, 0.0 }
  0xb3   : > { %v304_v49 = vmul.f32 %v264_v36, %v264_v36  ;;  %vm551_vm3 = vcmask 1043459  }
  0xb4   : > { %v338_v41 = vrot.slane %v318_v39, 6  ;;  %v337_v42 = vrot.slane %v317_v40, 6  ;;  %v586_v39 = vsel %vm790_vm4, %v578_v23, %v1180_v3  ;;  %v308_v3 = vmul.f32 %v268_v35, %v268_v35 }
  0xb6   : > { %v339_v43 = vsel %vm327_vm0, %v337_v42, %v338_v41  ;;  %v254_v41 = vsel %vm242_vm1, %v252_v61, %v253_v27  ;;  %v592_v61 = vsel %vm591_vm10, %v583_v38, 0.0 }
  0xb7   : > { %352 = vrot.lane.b32.xlu2 %v337_v42, %s1047_s21  ;;  %354 = vrot.lane.b32.xlu0 %v339_v43, %s1047_s21  ;;  %v582_v42 = vsub.f32 1.0, %v1189_v6 }
  0xb9   : > { %v590_v11 = vsel %vm794_vm9, %v582_v42, %v1189_v6  ;;  %vm484_vm9 = vcmask 1045504  }
 0x100   : > { %v341_v53 = vpop.permute.xlu2 %340 }
 0x101   : > { %v364_v54 = vadd.f32 %v341_v53, %v303_v50  ;;  %v349_v55 = vpop.permute.xlu0 %348  ;;  %v270_v50 = vsub.f32 %v1189_v6, %v254_v41 }
 0x102   : > { %v368_v56 = vadd.f32 %v349_v55, %v307_v51  ;;  %v587_v55 = vsel %vm791_vm6, %v579_v31, %v1177_v2  ;;  %v602_v2 = vsel %vm591_vm10, %v586_v39, 0.0 }
 0x103   : > { %v1223_v58 = vadd.f32 1e-06, %v364_v54  ;;  %v610_v9 = vsel %vm591_vm10, %v587_v55, 0.0 }
 0x104   : > { %v1225_v59 = vadd.f32 1e-06, %v368_v56  ;;  %v588_v56 = vsel %vm792_vm7, %v580_v47, %v1184_v5  ;;  %v310_v5 = vmul.f32 %v270_v50, %v270_v50 }
 0x105   : > { %878 = vrsqrt.f32 %v1223_v58  ;;  %v390_v1 = vand.u32 2147483648, %v1223_v58  ;;  %v611_v16 = vsel %vm591_vm10, %v588_v56, 0.0  ;;  %vm387_vm12 = vcmp.eq.f32.partialorder %v1223_v58, inf }
 0x106   : > { %880 = vrsqrt.f32 %v1225_v59  ;;  %v612_v17 = vadd.f32 %v611_v16, %v610_v9  ;;  %vm435_vm14 = vcmp.eq.f32.partialorder %v1225_v59, inf  ;;  %vm389_vm4 = vcmp.eq.f32.partialorder %v1223_v58, 0.0 }
 0x107   : > { %vm437_vm7 = vcmp.eq.f32.partialorder %v1225_v59, 0.0 }
 0x109   : > { %v347_v63 = vpop.permute.xlu2 %346 }
 0x10a   : > { %v367_v8 = vadd.f32 %v347_v63, %v306_v60  ;;  %v589_v60 = vsel %vm793_vm8, %v581_v46, %v1191_v7  ;;  %v594_v63 = vadd.f32 %v593_v62, %v592_v61 }
 0x10b   : > { %v879_v10 = vpop.eup %878 }
 0x10c   : > { %v1234_v12 = vpop.eup %880  ;;  %v381_v13 = vmul.f32 %v879_v10, %v1223_v58  ;;  %v1237_v14 = vadd.f32 1e-06, %v367_v8  ;;  %v601_v8 = vsel %vm591_vm10, %v585_v34, 0.0  ;;  %v595_v7 = vrot.slane %v594_v63, 4 }
 0x10d   : > { %v429_v18 = vmul.f32 %v1234_v12, %v1225_v59  ;;  %v603_v15 = vadd.f32 %v602_v2, %v601_v8 }
 0x10e   : > { %v382_v19 = vmul.f32 %v879_v10, %v381_v13  ;;  %882 = vrsqrt.f32 %v1237_v14  ;;  %v596_v6 = vadd.f32 %v595_v7, %v594_v63  ;;  %vm423_vm11 = vcmp.eq.f32.partialorder %v1237_v14, inf }
 0x10f   : > { %v430_v24 = vmul.f32 %v1234_v12, %v429_v18  ;;  %v619_v18 = vsel %vm591_vm10, %v589_v60, 0.0  ;;  %vm425_vm0 = vcmp.eq.f32.partialorder %v1237_v14, 0.0 }
 0x110   : > { %v383_v28 = vmul.f32 0.5, %v382_v19  ;;  %v426_v19 = vand.u32 2147483648, %v1237_v14  ;;  %v597_v32 = vrot.slane %v596_v6, 2 }
 0x111   : > { %v353_v29 = vpop.permute.xlu2 %352  ;;  %v431_v40 = vmul.f32 0.5, %v430_v24  ;;  %v604_v24 = vrot.slane %v603_v15, 4 }
 0x112   : > { %v370_v33 = vadd.f32 %v353_v29, %v309_v20  ;;  %v384_v43 = vsub.f32 1.5, %v383_v28  ;;  %v438_v20 = vand.u32 2147483648, %v1225_v59  ;;  %v613_v28 = vrot.slane %v612_v17, 4 }
 0x113   : > { %v432_v51 = vsub.f32 1.5, %v431_v40  ;;  %v598_v42 = vadd.f32 %v597_v32, %v596_v6 }
 0x114   : > { %v1265_v37 = vpop.eup %882  ;;  %v1276_v48 = vadd.f32 1e-06, %v370_v33  ;;  %v385_v4 = vmul.f32 %v879_v10, %v384_v43  ;;  %v605_v33 = vadd.f32 %v604_v24, %v603_v15  ;;  %v614_v38 = vadd.f32 %v613_v28, %v612_v17 }
 0x115   : > { %v417_v0 = vmul.f32 %v1265_v37, %v1237_v14  ;;  %v433_v13 = vmul.f32 %v1234_v12, %v432_v51  ;;  %v620_v12 = vsel %vm591_vm10, %v590_v11, 0.0  ;;  %v599_v47 = vrot.slane %v598_v42, 1 }
 0x116   : > { %884 = vrsqrt.f32 %v1276_v48  ;;  %v1306_v22 = vmul.f32 %v385_v4, %v1223_v58  ;;  %v621_v29 = vadd.f32 %v620_v12, %v619_v18  ;;  %v606_v43 = vrot.slane %v605_v33, 2 }
 0x117   : > { %v418_v53 = vmul.f32 %v1265_v37, %v417_v0  ;;  %v1310_v30 = vmul.f32 %v433_v13, %v1225_v59 }
 0x118   : > { %v345_v52 = vpop.permute.xlu1 %344  ;;  %v622_v39 = vrot.slane %v621_v29, 4 }
 0x119   : > { %v366_v54 = vadd.f32 %v345_v52, %v305_v44  ;;  %v419_v10 = vmul.f32 0.5, %v418_v53  ;;  %v615_v44 = vrot.slane %v614_v38, 2  ;;  %v600_v52 = vadd.f32 %v599_v47, %v598_v42 }
 0x11a   : > { %v623_v45 = vadd.f32 %v622_v39, %v621_v29 }
 0x11b   : > { %v1288_v57 = vadd.f32 1e-06, %v366_v54  ;;  %v420_v25 = vsub.f32 1.5, %v419_v10  ;;  %v616_v50 = vadd.f32 %v615_v44, %v614_v38 }
 0x11c   : > { %v1303_v21 = vpop.eup %884  ;;  %v624_v51 = vrot.slane %v623_v45, 2 }
 0x11d   : > { %886 = vrsqrt.f32 %v1288_v57  ;;  %v453_v35 = vmul.f32 %v1303_v21, %v1276_v48  ;;  %v421_v0 = vmul.f32 %v1265_v37, %v420_v25  ;;  %vm411_vm2 = vcmp.eq.f32.partialorder %v1288_v57, inf }
 0x11e   : > { %v617_v54 = vrot.slane %v616_v50, 1  ;;  %v625_v55 = vadd.f32 %v624_v51, %v623_v45  ;;  %v414_v2 = vand.u32 2147483648, %v1288_v57  ;;  %vm413_vm6 = vcmp.eq.f32.partialorder %v1288_v57, 0.0 }
 0x11f   : > { %v422_v56 = vmul.f32 %v421_v0, %v1237_v14 }
 0x120   : > { %v351_v23 = vpop.permute.xlu1 %350  ;;  %v618_v9 = vadd.f32 %v617_v54, %v616_v50  ;;  %v626_v10 = vrot.slane %v625_v55, 1 }
 0x121   : > { %v369_v26 = vadd.f32 %v351_v23, %v308_v3  ;;  %v343_v27 = vpop.permute.xlu0 %342  ;;  %v607_v3 = vadd.f32 %v606_v43, %v605_v33  ;;  %v424_v24 = vsel %vm423_vm11, %v1237_v14, %v422_v56  ;;  %vm505_vm11 = vcmask 113664  }
 0x122   : > { %v365_v31 = vadd.f32 %v343_v27, %v304_v49  ;;  %v454_v49 = vmul.f32 %v1303_v21, %v453_v35  ;;  %v627_v18 = vadd.f32 %v626_v10, %v625_v55  ;;  %v388_v27 = vsel %vm387_vm12, %v1223_v58, %v1306_v22 }
 0x123   : > { %v887_v34 = vpop.eup %886  ;;  %v1314_v36 = vadd.f32 1e-06, %v369_v26  ;;  %v608_v4 = vrot.slane %v607_v3, 1  ;;  %v391_v22 = vsel %vm389_vm4, %v390_v1, %v388_v27  ;;  %vm507_vm12 = vcmask 111616  }
 0x124   : > { %v405_v40 = vmul.f32 %v887_v34, %v1288_v57  ;;  %v1317_v41 = vadd.f32 1e-06, %v365_v31  ;;  %v455_v8 = vmul.f32 0.5, %v454_v49  ;;  %v485_v55 = vrot.slane %v391_v22, 2 }
 0x125   : > { %888 = vrsqrt.f32 %v1314_v36  ;;  %v609_v62 = vadd.f32 %v608_v4, %v607_v3  ;;  %vm447_vm10 = vcmp.eq.f32.partialorder %v1314_v36, inf  ;;  %v450_v44 = vand.u32 2147483648, %v1314_v36 }
 0x126   : > { %v406_v46 = vmul.f32 %v887_v34, %v405_v40  ;;  %890 = vrsqrt.f32 %v1317_v41  ;;  %v456_v12 = vsub.f32 1.5, %v455_v8  ;;  %vm399_vm8 = vcmp.eq.f32.partialorder %v1317_v41, inf }
 0x127   : > { %v632_v16 = vsel %vm547_vm13, %v609_v62, %v600_v52  ;;  %v402_v39 = vand.u32 2147483648, %v1317_v41  ;;  %vm461_vm4 = vcmp.eq.f32.partialorder %v1276_v48, 0.0 }
 0x128   : > { %v407_v37 = vmul.f32 0.5, %v406_v46  ;;  %v457_v58 = vmul.f32 %v1303_v21, %v456_v12 }
 0x129   : > { %v355_v53 = vpop.permute.xlu0 %354 }
 0x12a   : > { %v408_v60 = vsub.f32 1.5, %v407_v37  ;;  %v371_v61 = vadd.f32 %v355_v53, %v310_v5  ;;  %v633_v5 = vsel %vm549_vm15, %v618_v9, %v632_v16  ;;  %v462_v9 = vand.u32 2147483648, %v1276_v48 }
 0x12b   : > { %v889_v63 = vpop.eup %888  ;;  %v634_v26 = vsel %vm551_vm3, %v627_v18, %v633_v5 }
 0x12c   : > { %v891_v11 = vpop.eup %890  ;;  %v409_v13 = vmul.f32 %v887_v34, %v408_v60  ;;  %v441_v7 = vmul.f32 %v889_v63, %v1314_v36  ;;  %v1332_v15 = vadd.f32 1e-06, %v371_v61  ;;  %v637_v29 = vsel %vm636_vm5, %v634_v26, 0.0 }
 0x12d   : > { %v393_v17 = vmul.f32 %v891_v11, %v1317_v41  ;;  %638 = vadd.xlane.f32.xlu2 %v637_v29  ;;  %v427_v34 = vsel %vm425_vm0, %v426_v19, %v424_v24  ;;  %vm401_vm0 = vcmp.eq.f32.partialorder %v1317_v41, 0.0 }
 0x12e   : > { %v410_v23 = vmul.f32 %v409_v13, %v1288_v57  ;;  %v442_v6 = vmul.f32 %v889_v63, %v441_v7  ;;  %892 = vrsqrt.f32 %v1332_v15  ;;  %v489_v1 = vrot.slane %v427_v34, 2 }
 0x12f   : > { %v394_v25 = vmul.f32 %v891_v11, %v393_v17  ;;  %vm471_vm5 = vcmp.eq.f32.partialorder %v1332_v15, inf  ;;  %v474_v18 = vand.u32 2147483648, %v1332_v15 }
 0x130   : > { %v443_v28 = vmul.f32 0.5, %v442_v6  ;;  %v412_v31 = vsel %vm411_vm2, %v1288_v57, %v410_v23  ;;  %v436_v57 = vsel %vm435_vm14, %v1225_v59, %v1310_v30  ;;  %v517_v3 = vsel %vm507_vm12, %v489_v1, 0.0 }
 0x131   : > { %v395_v32 = vmul.f32 0.5, %v394_v25  ;;  %v415_v33 = vsel %vm413_vm6, %v414_v2, %v412_v31  ;;  %v439_v30 = vsel %vm437_vm7, %v438_v20, %v436_v57  ;;  %vm449_vm14 = vcmp.eq.f32.partialorder %v1314_v36, 0.0 }
 0x132   : > { %v444_v35 = vsub.f32 1.5, %v443_v28  ;;  %v488_v14 = vrot.slane %v415_v33, 2  ;;  %v458_v59 = vmul.f32 %v457_v58, %v1276_v48  ;;  %vm459_vm2 = vcmp.eq.f32.partialorder %v1276_v48, inf }
 0x133   : > { %v396_v38 = vsub.f32 1.5, %v395_v32  ;;  %v491_v4 = vrot.slane %v439_v30, 2  ;;  %vm473_vm6 = vcmp.eq.f32.partialorder %v1332_v15, 0.0  ;;  %vm554_vm7 = vcmask 109568  }
 0x134   : > { %v893_v19 = vpop.eup %892  ;;  %v445_v40 = vmul.f32 %v889_v63, %v444_v35  ;;  %v490_v45 = vsel %vm484_vm9, %v488_v14, %v489_v1  ;;  %v460_v60 = vsel %vm459_vm2, %v1276_v48, %v458_v59 }
 0x135   : > { %v397_v42 = vmul.f32 %v891_v11, %v396_v38  ;;  %v465_v43 = vmul.f32 %v893_v19, %v1332_v15  ;;  %v516_v47 = vsel %vm505_vm11, %v490_v45, 0.0  ;;  %v463_v17 = vsel %vm461_vm4, %v462_v9, %v460_v60 }
 0x136   : > { %v446_v0 = vmul.f32 %v445_v40, %v1314_v36  ;;  %v518_v20 = vadd.f32 %v517_v3, %v516_v47  ;;  %v494_v25 = vrot.slane %v463_v17, 2  ;;  %v641_v47 = vlaneseq }
 0x137   : > { %v398_v46 = vmul.f32 %v397_v42, %v1317_v41  ;;  %v466_v21 = vmul.f32 %v893_v19, %v465_v43 }
 0x138   : > { %v448_v49 = vsel %vm447_vm10, %v1314_v36, %v446_v0  ;;  %v519_v36 = vrot.slane %v518_v20, 4  ;;  %v642_v3 = vand.u32 127, %v641_v47 }
 0x139   : > { %v400_v50 = vsel %vm399_vm8, %v1317_v41, %v398_v46  ;;  %v451_v51 = vsel %vm449_vm14, %v450_v44, %v448_v49  ;;  %v467_v37 = vmul.f32 0.5, %v466_v21 }
 0x13a   : > { %v403_v52 = vsel %vm401_vm0, %v402_v39, %v400_v50  ;;  %v492_v53 = vrot.slane %v451_v51, 2  ;;  %v520_v16 = vadd.f32 %v519_v36, %v518_v20 }
 0x13b   : > { %v468_v54 = vsub.f32 1.5, %v467_v37  ;;  %v486_v56 = vrot.slane %v403_v52, 2 }
 0x13c   : > { %v493_v61 = vsel %vm484_vm9, %v491_v4, %v492_v53  ;;  %v526_v62 = vsel %vm507_vm12, %v492_v53, 0.0  ;;  %v521_v27 = vrot.slane %v520_v16, 2 }
 0x13d   : > { %v469_v63 = vmul.f32 %v893_v19, %v468_v54  ;;  %v487_v41 = vsel %vm484_vm9, %v485_v55, %v486_v56  ;;  %v508_v8 = vsel %vm507_vm12, %v486_v56, 0.0  ;;  %v525_v2 = vsel %vm505_vm11, %v493_v61, 0.0 }
 0x13e   : > { %v506_v10 = vsel %vm505_vm11, %v487_v41, 0.0  ;;  %v527_v11 = vadd.f32 %v526_v62, %v525_v2  ;;  %v522_v22 = vadd.f32 %v521_v27, %v520_v16 }
 0x13f   : > { %v470_v13 = vmul.f32 %v469_v63, %v1332_v15  ;;  %v509_v7 = vadd.f32 %v508_v8, %v506_v10 }
 0x140   : > { %v528_v5 = vrot.slane %v527_v11, 4  ;;  %v523_v39 = vrot.slane %v522_v22, 1 }
 0x141   : > { %v472_v23 = vsel %vm471_vm5, %v1332_v15, %v470_v13  ;;  %v510_v6 = vrot.slane %v509_v7, 4 }
 0x142   : > { %v475_v24 = vsel %vm473_vm6, %v474_v18, %v472_v23  ;;  %v529_v12 = vadd.f32 %v528_v5, %v527_v11  ;;  %v524_v1 = vadd.f32 %v523_v39, %v522_v22 }
 0x143   : > { %v495_v26 = vrot.slane %v475_v24, 2  ;;  %v511_v48 = vadd.f32 %v510_v6, %v509_v7 }
 0x144   : > { %v530_v32 = vrot.slane %v529_v12, 2 }
 0x145   : > { %v496_v28 = vsel %vm484_vm9, %v494_v25, %v495_v26  ;;  %v512_v29 = vrot.slane %v511_v48, 2  ;;  %v535_v31 = vsel %vm507_vm12, %v495_v26, 0.0 }
 0x146   : > { %v534_v33 = vsel %vm505_vm11, %v496_v28, 0.0  ;;  %v531_v38 = vadd.f32 %v530_v32, %v529_v12 }
 0x147   : > { %v513_v34 = vadd.f32 %v512_v29, %v511_v48  ;;  %v536_v57 = vadd.f32 %v535_v31, %v534_v33 }
 0x148   : > { %v532_v58 = vrot.slane %v531_v38, 1 }
 0x149   : > { %v514_v35 = vrot.slane %v513_v34, 1  ;;  %v537_v15 = vrot.slane %v536_v57, 4 }
 0x14a   : > { %v533_v0 = vadd.f32 %v532_v58, %v531_v38 }
 0x14b   : > { %v538_v14 = vadd.f32 %v537_v15, %v536_v57  ;;  %v515_v19 = vadd.f32 %v514_v35, %v513_v34 }
 0x14d   : > { %v539_v40 = vrot.slane %v538_v14, 2  ;;  %v548_v30 = vsel %vm547_vm13, %v524_v1, %v515_v19  ;;  %vm649_vm13 = vcmask 25600  }
 0x14e   : > { %v550_v45 = vsel %vm549_vm15, %v533_v0, %v548_v30 }
 0x14f   : > { %v540_v42 = vadd.f32 %v539_v40, %v538_v14 }
 0x151   : > { %v541_v43 = vrot.slane %v540_v42, 1 }
 0x153   : > { %v542_v44 = vadd.f32 %v541_v43, %v540_v42 }
 0x155   : > { %v552_v46 = vsel %vm551_vm3, %v542_v44, %v550_v45 }
 0x156   : > { %v555_v21 = vsel %vm554_vm7, %v552_v46, 0.0 }
 0x157   : > { %556 = vadd.xlane.f32.xlu1 %v555_v21 }
 0x1a0   : > { %v639_v49 = vpop.xlane.xlu2 %638 }
 0x1a1   : > { %v646_v59 = vperm.slane %v639_v49, %v642_v3 }
 0x1ca   : > { %v557_v20 = vpop.xlane.xlu1 %556 }
 0x1cb   : > { %v643_v50 = vperm.slane %v557_v20, %v642_v3 }
 0x1cd   : > { %v648_v51 = vsel %vm242_vm1, %v643_v50, %v646_v59 }
 0x1ce   : > { %650 = vst.msk [vmem:[%s224_s27] sm:$0x3] %vm649_vm13, %v648_v51 }
 0x1cf   : > { %981 = shalt.err (!%p978_p13)
}
 0x1d0   : > { %809 = dma.vmem_to_hbm [thread:$0]  (%p1114_p9), %s666_s28, 32, %s668_s29, %s652_s12  }
 0x1d1 PF: > { %s679_s4 = sand.u32 1, %s1020_s9   ;;  %p819_p0 = pnand %p776_p12, %p1121_p11 }
 0x1d2   : > { %s680_s6 = scalar_lea.sflag [#allocation4], %s679_s4 }
 0x1d3   : > { %p820_p1 = pneg %p819_p0 }
 0x1d5   : > { %1015 = dma.done.wait (%p820_p1), %s680_s6, 32  }
 0x1d6   : > { %1017 = vsyncadd (%p820_p1), %s680_s6, 4294967264  ;;  %s21_s14 = sadd.s32 1, %s1040_s14   ;;  %s1457_s9 = smov %s1024_s10 }
 0x1d7   : > { %p18_p2 = scmp.ge.s32.totalorder %s21_s14, 4   ;;  %s1458_s10 = smov %s1028_s11 }
 0x1d8   : > { %s1459_s11 = smov %s1119_s23  ;;  %s1460_s12 = smov %s1036_s13 }
 0x1d9   : > { %s1461_s13 = smov %s1463_s17  ;;  %20 = sbr.rel (!%p18_p2) target bundleno = 10 (0xa), region = 86 }
 0x1de   :  { %686 = vsyncpa [#allocation3], 1 }
 0x1df   :  { %688 = vsyncpa [#allocation3 + $0x1], 1 }
 0x1e0   :  { %689 = vsyncpa [#allocation6], 1 }
 0x1e1   :  { %691 = vsyncpa [#allocation6 + $0x1], 1 }
 0x1e2   :  { %692 = vsyncpa [#allocation4], 1 }
 0x1e3   :  { %694 = vsyncpa [#allocation4 + $0x1], 1 }

</bundles_post_ra>
